<compile_context>
chip_gen: v7x
topology: tpu7x:2x2x1
jax: 0.10.0
libtpu: 0.0.40
codegen_flags: <defaults>
</compile_context>

<pallas_src>
import functools

import jax
import jax.numpy as jnp
from jax.experimental import pallas as pl
from jax.experimental.pallas import tpu as pltpu

_EPSILON = 1e-12  # matches ATen cosine_embedding_loss EPSILON
_LANES = 128
_SUBLANES = 8
_D_CHUNK_MAX = 2048            # feature-axis chunk (lane columns) per grid step
_MIN_ROWS_PER_TILE = 512       # amortize ~0.35us per-grid-step overhead
_TARGET_MIN_TILES = 8          # keep both v7x TCs + pipeline depth busy
_FALLBACK_VMEM_BYTES = 64 * 1024 * 1024  # conservative (v7x per-TC capacity)


def _vmem_limit_bytes() -> int:
    """~0.7x of this chip's per-core VMEM, with a conservative fallback."""
    try:
        cap = int(pltpu.get_tpu_info().vmem_capacity_bytes)
    except Exception:  # pragma: no cover - e.g. attribute rename / no device
        cap = _FALLBACK_VMEM_BYTES
    return max(int(cap * 0.7), 16 * 1024 * 1024)


def _choose_d_chunk(d: int) -> int:
    """Feature-axis chunk: full D if small, else a multiple of 128 (ideally a divisor)."""
    if d <= _D_CHUNK_MAX:
        return d  # full extent -> always a legal block shape, no column mask
    for c in range(_D_CHUNK_MAX, 127, -128):
        if d % c == 0:
            return c
    return _D_CHUNK_MAX  # tail chunk will be column-masked


def _choose_tile_n(n: int, d_chunk: int, itemsize: int, budget_bytes: int) -> int:
    """Largest multiple-of-8 row tile whose *real* VMEM footprint fits the budget."""
    # 2 inputs x 2 pipeline buffers at the HBM dtype + ~4 chunk-sized f32
    # intermediates (s, t and the live products) inside the kernel body.
    per_row = d_chunk * (4 * itemsize + 4 * 4)
    rows = max(budget_bytes // per_row, _SUBLANES)
    rows = (rows // _SUBLANES) * _SUBLANES
    # Cap so a large batch yields >= ~_TARGET_MIN_TILES grid steps (v7x dual-TC
    # + pipeline), but never drop below _MIN_ROWS_PER_TILE rows.
    target = max(
        _MIN_ROWS_PER_TILE,
        _SUBLANES * ((n + _TARGET_MIN_TILES * _SUBLANES - 1)
                     // (_TARGET_MIN_TILES * _SUBLANES)),
    )
    rows = max(min(rows, target), _SUBLANES)
    if n <= rows:
        return n  # full extent (always a legal block shape)
    return int(rows)


def _out_cos_loss_kernel(stu_ref, tea_ref, partial_ref,
                         dot_acc, m1_acc, m2_acc, *,
                         n_rows, tile_n, d, d_chunk,
                         needs_row_mask, needs_col_mask):
    i = pl.program_id(0)              # row-tile index (parallel)
    k = pl.program_id(1)              # feature-chunk index (arbitrary / reduction)
    nk = pl.num_programs(1)

    @pl.when(k == 0)
    def _():
        dot_acc[...] = jnp.zeros_like(dot_acc)
        m1_acc[...] = jnp.zeros_like(m1_acc)
        m2_acc[...] = jnp.zeros_like(m2_acc)

    # One chunk at a time: bounded f32 intermediates regardless of D.
    s = stu_ref[...].astype(jnp.float32)   # (tile_n, d_chunk)
    t = tea_ref[...].astype(jnp.float32)   # (tile_n, d_chunk)

    if needs_col_mask:
        col = jax.lax.broadcasted_iota(jnp.int32, (tile_n, d_chunk), 1) + k * d_chunk
        valid = col < d
        s = jnp.where(valid, s, 0.0)
        t = jnp.where(valid, t, 0.0)

    dot_acc[...] += jnp.sum(s * t, axis=-1, keepdims=True)   # (tile_n, 1)
    m1_acc[...] += jnp.sum(s * s, axis=-1, keepdims=True)
    m2_acc[...] += jnp.sum(t * t, axis=-1, keepdims=True)

    @pl.when(k == nk - 1)
    def _():
        dot = dot_acc[...]
        m1 = m1_acc[...] + _EPSILON
        m2 = m2_acc[...] + _EPSILON
        # rsqrt lowers to the (otherwise idle) EUP; avoids the VPU divide chain.
        cos = dot * jax.lax.rsqrt(m1 * m2)
        per_sample = 1.0 - cos                                 # target = +1 branch

        if needs_row_mask:
            row = jax.lax.broadcasted_iota(jnp.int32, (tile_n, 1), 0) + i * tile_n
            per_sample = jnp.where(row < n_rows, per_sample, 0.0)

        # Per-tile partial SUM broadcast into a dense (8, 128) block -> unmasked
        # vst stores; only lane/sublane (0, 0) is consumed by the wrapper.
        partial = jnp.sum(per_sample)                          # scalar
        partial_ref[...] = jnp.full(partial_ref.shape, partial, jnp.float32)


def out_cos_loss(stu_out: jnp.ndarray, tea_out: jnp.ndarray, *,
                 tile_n=None, d_chunk=None) -> jnp.ndarray:
    """Pallas implementation of OutCosLoss.forward (returns a scalar loss)."""
    assert stu_out.shape == tea_out.shape and stu_out.ndim == 2
    n, d = stu_out.shape

    vmem_limit = _vmem_limit_bytes()
    if d_chunk is None:
        d_chunk = _choose_d_chunk(d)
    d_chunk = int(min(d_chunk, d))
    if tile_n is None:
        # ~80% of the limit for the streamed tiles; the rest is headroom for
        # output double-buffers, semaphores and Mosaic internal scratch.
        tile_n = _choose_tile_n(n, d_chunk, stu_out.dtype.itemsize,
                                int(vmem_limit * 0.8))
    tile_n = int(min(tile_n, n))

    num_tiles = pl.cdiv(n, tile_n)
    num_chunks = pl.cdiv(d, d_chunk)
    needs_row_mask = (n % tile_n) != 0
    needs_col_mask = (d % d_chunk) != 0

    kernel = functools.partial(
        _out_cos_loss_kernel,
        n_rows=n, tile_n=tile_n, d=d, d_chunk=d_chunk,
        needs_row_mask=needs_row_mask, needs_col_mask=needs_col_mask,
    )

    cost = pl.CostEstimate(
        flops=8 * n * d,
        transcendentals=n,
        bytes_accessed=2 * n * d * stu_out.dtype.itemsize
                       + num_tiles * _SUBLANES * _LANES * 4,
    )

    partials = pl.pallas_call(
        kernel,
        out_shape=jax.ShapeDtypeStruct((num_tiles, _SUBLANES, _LANES), jnp.float32),
        grid_spec=pltpu.PrefetchScalarGridSpec(
            num_scalar_prefetch=0,
            grid=(num_tiles, num_chunks),          # reduction (chunk) axis last
            in_specs=[
                pl.BlockSpec((tile_n, d_chunk), lambda i, k: (i, k)),
                pl.BlockSpec((tile_n, d_chunk), lambda i, k: (i, k)),
            ],
            out_specs=pl.BlockSpec((1, _SUBLANES, _LANES), lambda i, k: (i, 0, 0)),
            scratch_shapes=[
                pltpu.VMEM((tile_n, 1), jnp.float32),   # dot accumulator
                pltpu.VMEM((tile_n, 1), jnp.float32),   # |stu|^2 accumulator
                pltpu.VMEM((tile_n, 1), jnp.float32),   # |tea|^2 accumulator
            ],
        ),
        compiler_params=pltpu.CompilerParams(
            dimension_semantics=("parallel", "arbitrary"),
            vmem_limit_bytes=vmem_limit,
        ),
        cost_estimate=cost,
    )(stu_out, tea_out)

    # Finalize in JAX: sum the per-tile partials, divide by the TRUE batch size.
    return jnp.sum(partials[:, 0, 0]) / jnp.float32(n)


def _reference(stu, tea):
    s = stu.astype(jnp.float32)
    t = tea.astype(jnp.float32)
    dot = jnp.sum(s * t, axis=-1)
    m1 = jnp.sum(s * s, axis=-1) + _EPSILON
    m2 = jnp.sum(t * t, axis=-1) + _EPSILON
    cos = dot / jnp.sqrt(m1 * m2)
    return jnp.mean(1.0 - cos)


if __name__ == "__main__":
    key = jax.random.PRNGKey(0)
    k1, k2, k3, k4, k5, k6, k7, k8 = jax.random.split(key, 8)

    # Test 1: small f32 case, single row tile, single feature chunk.
    N1, D1 = 8, 128
    stu1 = jax.random.normal(k1, (N1, D1), dtype=jnp.float32)
    tea1 = jax.random.normal(k2, (N1, D1), dtype=jnp.float32)
    loss1 = out_cos_loss(stu1, tea1)
    jax.block_until_ready(loss1)
    ref1 = _reference(stu1, tea1)
    assert jnp.allclose(loss1, ref1, atol=1e-5, rtol=1e-5), (loss1, ref1)

    # Test 2: batch not divisible by the row tile -> exercises tail-row masking.
    N2, D2 = 12, 32
    stu2 = jax.random.normal(k3, (N2, D2), dtype=jnp.float32)
    tea2 = jax.random.normal(k4, (N2, D2), dtype=jnp.float32)
    loss2 = out_cos_loss(stu2, tea2, tile_n=8)  # 2 tiles, last one partial
    jax.block_until_ready(loss2)
    ref2 = _reference(stu2, tea2)
    assert jnp.allclose(loss2, ref2, atol=1e-5, rtol=1e-5), (loss2, ref2)

    # Test 3: bf16 inputs streamed from HBM, f32 accumulation in-kernel.
    N3, D3 = 16, 128
    stu3 = jax.random.normal(k5, (N3, D3), dtype=jnp.float32).astype(jnp.bfloat16)
    tea3 = jax.random.normal(k6, (N3, D3), dtype=jnp.float32).astype(jnp.bfloat16)
    loss3 = out_cos_loss(stu3, tea3)
    jax.block_until_ready(loss3)
    ref3 = _reference(stu3, tea3)
    assert jnp.allclose(loss3, ref3, atol=1e-4, rtol=1e-4), (loss3, ref3)

    # Test 4: multi-chunk feature reduction with BOTH a partial row tile and a
    # partial (column-masked) feature chunk.
    N4, D4 = 12, 160
    stu4 = jax.random.normal(k7, (N4, D4), dtype=jnp.float32)
    tea4 = jax.random.normal(k8, (N4, D4), dtype=jnp.float32)
    loss4 = out_cos_loss(stu4, tea4, tile_n=8, d_chunk=128)  # grid (2, 2)
    jax.block_until_ready(loss4)
    ref4 = _reference(stu4, tea4)
    assert jnp.allclose(loss4, ref4, atol=1e-5, rtol=1e-5), (loss4, ref4)

    print("KERNEL_OK")
</pallas_src>

<mosaic_0001>
module attributes {stable_mosaic.version = 11 : i64} {
  func.func @_out_cos_loss_kernel(%arg0: i32, %arg1: i32, %arg2: memref<8x128xf32, #tpu.memory_space<vmem>>, %arg3: memref<8x128xf32, #tpu.memory_space<vmem>>, %arg4: memref<1x8x128xf32, #tpu.memory_space<vmem>>, %arg5: memref<8x1xf32, #tpu.memory_space<vmem>>, %arg6: memref<8x1xf32, #tpu.memory_space<vmem>>, %arg7: memref<8x1xf32, #tpu.memory_space<vmem>>) attributes {dimension_semantics = [#tpu.dimension_semantics<parallel>, #tpu.dimension_semantics<arbitrary>], iteration_bounds = array<i64: 1, 1>, scalar_prefetch = 0 : i64, scratch_operands = 3 : i64, tpu.core_type = #tpu.core_type<tc>, window_params = [{transform_indices = @transform_0, window_bounds = array<i64: 8, 128>}, {transform_indices = @transform_1, window_bounds = array<i64: 8, 128>}, {transform_indices = @transform_2, window_bounds = array<i64: 1, 8, 128>}]} {
    %c0_i32 = arith.constant 0 : i32
    %0 = arith.cmpi eq, %arg1, %c0_i32 : i32
    %1 = arith.extui %0 : i1 to i32
    %c0_i32_0 = arith.constant 0 : i32
    %2 = arith.cmpi ne, %1, %c0_i32_0 : i32
    scf.if %2 {
      %cst_20 = arith.constant 0.000000e+00 : f32
      %26 = vector.broadcast %cst_20 : f32 to vector<8x1xf32>
      %c0_21 = arith.constant 0 : index
      %c0_22 = arith.constant 0 : index
      %27 = vector.load %arg5[%c0_21, %c0_22] : memref<8x1xf32, #tpu.memory_space<vmem>>, vector<8x1xf32>
      tpu.vector_store %arg5[%c0_21, %c0_22], %26 {strides = array<i32>} : memref<8x1xf32, #tpu.memory_space<vmem>>, vector<8x1xf32>,
      %cst_23 = arith.constant 0.000000e+00 : f32
      %28 = vector.broadcast %cst_23 : f32 to vector<8x1xf32>
      %c0_24 = arith.constant 0 : index
      %c0_25 = arith.constant 0 : index
      %29 = vector.load %arg6[%c0_24, %c0_25] : memref<8x1xf32, #tpu.memory_space<vmem>>, vector<8x1xf32>
      tpu.vector_store %arg6[%c0_24, %c0_25], %28 {strides = array<i32>} : memref<8x1xf32, #tpu.memory_space<vmem>>, vector<8x1xf32>,
      %cst_26 = arith.constant 0.000000e+00 : f32
      %30 = vector.broadcast %cst_26 : f32 to vector<8x1xf32>
      %c0_27 = arith.constant 0 : index
      %c0_28 = arith.constant 0 : index
      %31 = vector.load %arg7[%c0_27, %c0_28] : memref<8x1xf32, #tpu.memory_space<vmem>>, vector<8x1xf32>
      tpu.vector_store %arg7[%c0_27, %c0_28], %30 {strides = array<i32>} : memref<8x1xf32, #tpu.memory_space<vmem>>, vector<8x1xf32>,
    } else {
    }
    %c0 = arith.constant 0 : index
    %c0_1 = arith.constant 0 : index
    %3 = vector.load %arg2[%c0, %c0_1] : memref<8x128xf32, #tpu.memory_space<vmem>>, vector<8x128xf32>
    %c0_2 = arith.constant 0 : index
    %c0_3 = arith.constant 0 : index
    %4 = vector.load %arg3[%c0_2, %c0_3] : memref<8x128xf32, #tpu.memory_space<vmem>>, vector<8x128xf32>
    %c0_4 = arith.constant 0 : index
    %c0_5 = arith.constant 0 : index
    %5 = vector.load %arg5[%c0_4, %c0_5] : memref<8x1xf32, #tpu.memory_space<vmem>>, vector<8x1xf32>
    %6 = arith.mulf %3, %4 : vector<8x128xf32>
    %cst = arith.constant dense<0.000000e+00> : vector<8xf32>
    %7 = vector.multi_reduction <add>, %6, %cst [1] : vector<8x128xf32> to vector<8xf32>
    %8 = vector.shape_cast %7 : vector<8xf32> to vector<8x1xf32>
    %9 = arith.addf %5, %8 : vector<8x1xf32>
    %c0_6 = arith.constant 0 : index
    %c0_7 = arith.constant 0 : index
    %10 = vector.load %arg5[%c0_6, %c0_7] : memref<8x1xf32, #tpu.memory_space<vmem>>, vector<8x1xf32>
    tpu.vector_store %arg5[%c0_6, %c0_7], %9 {strides = array<i32>} : memref<8x1xf32, #tpu.memory_space<vmem>>, vector<8x1xf32>,
    %c0_8 = arith.constant 0 : index
    %c0_9 = arith.constant 0 : index
    %11 = vector.load %arg6[%c0_8, %c0_9] : memref<8x1xf32, #tpu.memory_space<vmem>>, vector<8x1xf32>
    %12 = arith.mulf %3, %3 : vector<8x128xf32>
    %cst_10 = arith.constant dense<0.000000e+00> : vector<8xf32>
    %13 = vector.multi_reduction <add>, %12, %cst_10 [1] : vector<8x128xf32> to vector<8xf32>
    %14 = vector.shape_cast %13 : vector<8xf32> to vector<8x1xf32>
    %15 = arith.addf %11, %14 : vector<8x1xf32>
    %c0_11 = arith.constant 0 : index
    %c0_12 = arith.constant 0 : index
    %16 = vector.load %arg6[%c0_11, %c0_12] : memref<8x1xf32, #tpu.memory_space<vmem>>, vector<8x1xf32>
    tpu.vector_store %arg6[%c0_11, %c0_12], %15 {strides = array<i32>} : memref<8x1xf32, #tpu.memory_space<vmem>>, vector<8x1xf32>,
    %c0_13 = arith.constant 0 : index
    %c0_14 = arith.constant 0 : index
    %17 = vector.load %arg7[%c0_13, %c0_14] : memref<8x1xf32, #tpu.memory_space<vmem>>, vector<8x1xf32>
    %18 = arith.mulf %4, %4 : vector<8x128xf32>
    %cst_15 = arith.constant dense<0.000000e+00> : vector<8xf32>
    %19 = vector.multi_reduction <add>, %18, %cst_15 [1] : vector<8x128xf32> to vector<8xf32>
    %20 = vector.shape_cast %19 : vector<8xf32> to vector<8x1xf32>
    %21 = arith.addf %17, %20 : vector<8x1xf32>
    %c0_16 = arith.constant 0 : index
    %c0_17 = arith.constant 0 : index
    %22 = vector.load %arg7[%c0_16, %c0_17] : memref<8x1xf32, #tpu.memory_space<vmem>>, vector<8x1xf32>
    tpu.vector_store %arg7[%c0_16, %c0_17], %21 {strides = array<i32>} : memref<8x1xf32, #tpu.memory_space<vmem>>, vector<8x1xf32>,
    %c0_i32_18 = arith.constant 0 : i32
    %23 = arith.cmpi eq, %arg1, %c0_i32_18 : i32
    %24 = arith.extui %23 : i1 to i32
    %c0_i32_19 = arith.constant 0 : i32
    %25 = arith.cmpi ne, %24, %c0_i32_19 : i32
    scf.if %25 {
      %c0_20 = arith.constant 0 : index
      %c0_21 = arith.constant 0 : index
      %26 = vector.load %arg5[%c0_20, %c0_21] : memref<8x1xf32, #tpu.memory_space<vmem>>, vector<8x1xf32>
      %c0_22 = arith.constant 0 : index
      %c0_23 = arith.constant 0 : index
      %27 = vector.load %arg6[%c0_22, %c0_23] : memref<8x1xf32, #tpu.memory_space<vmem>>, vector<8x1xf32>
      %cst_24 = arith.constant 9.99999996E-13 : f32
      %28 = vector.broadcast %cst_24 : f32 to vector<8x1xf32>
      %29 = arith.addf %27, %28 : vector<8x1xf32>
      %c0_25 = arith.constant 0 : index
      %c0_26 = arith.constant 0 : index
      %30 = vector.load %arg7[%c0_25, %c0_26] : memref<8x1xf32, #tpu.memory_space<vmem>>, vector<8x1xf32>
      %cst_27 = arith.constant 9.99999996E-13 : f32
      %31 = vector.broadcast %cst_27 : f32 to vector<8x1xf32>
      %32 = arith.addf %30, %31 : vector<8x1xf32>
      %33 = arith.mulf %29, %32 : vector<8x1xf32>
      %34 = math.rsqrt %33 : vector<8x1xf32>
      %35 = arith.mulf %26, %34 : vector<8x1xf32>
      %cst_28 = arith.constant 1.000000e+00 : f32
      %36 = vector.broadcast %cst_28 : f32 to vector<8x1xf32>
      %37 = arith.subf %36, %35 : vector<8x1xf32>
      %38 = vector.shape_cast %37 : vector<8x1xf32> to vector<1x8x1xf32>
      %cst_29 = arith.constant dense<0.000000e+00> : vector<1xf32>
      %39 = vector.multi_reduction <add>, %38, %cst_29 [1, 2] : vector<1x8x1xf32> to vector<1xf32>
      %40 = vector.shape_cast %39 : vector<1xf32> to vector<1x1x1xf32>
      %41 = vector.extract %40[0, 0, 0] : f32 from vector<1x1x1xf32>
      %42 = vector.broadcast %41 : f32 to vector<1x8x128xf32>
      %c0_30 = arith.constant 0 : index
      %c0_31 = arith.constant 0 : index
      %c0_32 = arith.constant 0 : index
      %43 = vector.load %arg4[%c0_30, %c0_31, %c0_32] : memref<1x8x128xf32, #tpu.memory_space<vmem>>, vector<1x8x128xf32>
      tpu.vector_store %arg4[%c0_30, %c0_31, %c0_32], %42 {strides = array<i32>} : memref<1x8x128xf32, #tpu.memory_space<vmem>>, vector<1x8x128xf32>,
    } else {
    }
    return
  }
  func.func @transform_0(%arg0: i32, %arg1: i32) -> (i32, i32) {
    %c0_i32 = arith.constant 0 : i32
    return %arg0, %arg1 : i32, i32
  }
  func.func @transform_1(%arg0: i32, %arg1: i32) -> (i32, i32) {
    %c0_i32 = arith.constant 0 : i32
    return %arg0, %arg1 : i32, i32
  }
  func.func @transform_2(%arg0: i32, %arg1: i32) -> (i32, i32, i32) {
    %c0_i32 = arith.constant 0 : i32
    %c0_i32_0 = arith.constant 0 : i32
    %c0_i32_1 = arith.constant 0 : i32
    return %arg0, %c0_i32, %c0_i32_0 : i32, i32, i32
  }
}

</mosaic_0001>

<bundles_post_ra>
// kernel: tpu_custom_call.1
= control target key start
LH: loop header
LB: loop body
LE: loop exit
PB: predicated region body
PF: predicated region fallthrough
CT: control target
= control target key end

     0   :  { %7 = vsyncpa [#allocation6], 0  ;;  %s247_s0 = inlined_call_operand.hbm [shape: f32[8,128], index: 0, kind: input, shape index: {}]   ;;  %s248_s1 = inlined_call_operand.hbm [shape: f32[8,128], index: 1, kind: input, shape index: {}]   ;;  %s249_s2 = inlined_call_operand.hbm [shape: f32[1,8,128], index: 2, kind: output, shape index: {}]  }
   0x1   :  { %8 = vsyncpa [#allocation9], 0 }
   0x2   :  { %9 = vsyncpa [#allocation7], 0  ;;  %s185_s9 = smov [#allocation5]   ;;  %s186_s11 = smov [#allocation8]  }
   0x3   :  { %s16_s10 = sshll.u32 %s185_s9, 4  ;;  %s26_s12 = sshll.u32 %s186_s11, 4  ;;  %s17_s10 = int_to_ptr.vmem [resolvable:$true] %s16_s10  ;;  %s27_s12 = int_to_ptr.vmem [resolvable:$true] %s26_s12 }
   0x4   :  { %s113_s15 = scalar_lea.hbm %s247_s0, 128 }
   0x5   :  { %p114_p0 = scmp.ne.s32.totalorder %s247_s0, %s113_s15  ;;  %p117_p1 = scmp.lt.u32.totalorder %s113_s15, %s247_s0 }
   0x7   :  { %p119_p2 = pnand %p117_p1, %p114_p0 }
   0x9   :  { %122 = shalt.err (!%p119_p2)
}
   0xa   :  { %s123_s20 = scalar_lea.vmem %s17_s10, 128  ;;  %p128_p4 = scmp.lt.s32.totalorder %s17_s10, %s17_s10 }
   0xb   :  { %p124_p3 = scmp.ne.s32.totalorder %s17_s10, %s123_s20  ;;  %p129_p5 = scmp.lt.s32.totalorder %s123_s20, %s123_s20 }
   0xd   :  { %p130_p6 = por %p129_p5, %p128_p4 }
   0xf   :  { %p131_p7 = pnand %p130_p6, %p124_p3 }
  0x11   :  { %134 = shalt.err (!%p131_p7)
}
  0x12   :  { %19 = dma.hbm_to_vmem [thread:$0]  %s247_s0, 128, %s17_s10, [#allocation6]  }
  0x13   :  { %s135_s25 = scalar_lea.hbm %s248_s1, 128 }
  0x14   :  { %p136_p8 = scmp.ne.s32.totalorder %s248_s1, %s135_s25  ;;  %p139_p9 = scmp.lt.u32.totalorder %s135_s25, %s248_s1 }
  0x16   :  { %p141_p10 = pnand %p139_p9, %p136_p8 }
  0x18   :  { %144 = shalt.err (!%p141_p10)
}
  0x19   :  { %s145_s30 = scalar_lea.vmem %s27_s12, 128  ;;  %p150_p12 = scmp.lt.s32.totalorder %s27_s12, %s27_s12 }
  0x1a   :  { %p146_p11 = scmp.ne.s32.totalorder %s27_s12, %s145_s30  ;;  %p151_p13 = scmp.lt.s32.totalorder %s145_s30, %s145_s30 }
  0x1c   :  { %p152_p0 = por %p151_p13, %p150_p12 }
  0x1e   :  { %p153_p1 = pnand %p152_p0, %p146_p11 }
  0x20   :  { %156 = shalt.err (!%p153_p1)
}
  0x21   :  { %29 = dma.hbm_to_vmem [thread:$0]  %s248_s1, 128, %s27_s12, [#allocation9]  }
  0x22   :  { %179 = dma.done.wait [#allocation6], 128  }
  0x23   :  { %180 = vsyncadd [#allocation6], 4294967168 }
  0x24   :  { %181 = dma.done.wait [#allocation9], 128  }
  0x25   :  { %182 = vsyncadd [#allocation9], 4294967168  ;;  %vm40_vm0 = vcmask 7168   ;;  %v187_v0 = vmov 0.0   ;;  %v44_v1 = vld [vmem:[#allocation5] sm:$0xff]  ;;  %v45_v2 = vld [vmem:[#allocation8] sm:$0xff] }
  0x26   :  { %42 = vst.msk [vmem:[#allocation3] sm:$0xff] %vm40_vm0, %v187_v0  ;;  %41 = vst.msk [vmem:[#allocation2] sm:$0xff] %vm40_vm0, %v187_v0  ;;  %v54_v3 = vmul.f32 %v44_v1, %v44_v1  ;;  %v47_v4 = vmul.f32 %v45_v2, %v44_v1  ;;  %v60_v5 = vmul.f32 %v45_v2, %v45_v2  ;;  %s188_s1 = smov [#allocation10]  }
  0x27   :  { %43 = vst.msk [vmem:[#allocation4] sm:$0xff] %vm40_vm0, %v187_v0  ;;  %s95_s4 = sshll.u32 %s188_s1, 4  ;;  %s96_s4 = int_to_ptr.vmem [resolvable:$true] %s95_s4 }
  0x28   :  { %55 = vadd.xlane.f32.xlu0 %v54_v3  ;;  %48 = vadd.xlane.f32.xlu1 %v47_v4  ;;  %s157_s6 = scalar_lea.vmem %s96_s4, 128  ;;  %p162_p3 = scmp.lt.s32.totalorder %s96_s4, %s96_s4 }
  0x29   :  { %p158_p2 = scmp.ne.s32.totalorder %s96_s4, %s157_s6  ;;  %p163_p4 = scmp.lt.s32.totalorder %s157_s6, %s157_s6 }
  0x2b   :  { %p164_p5 = por %p163_p4, %p162_p3 }
  0x2c   :  { %61 = vadd.xlane.f32.xlu0 %v60_v5 }
  0x2d   :  { %v53_v6 = vld [vmem:[#allocation3] sm:$0xff]  ;;  %v46_v7 = vld [vmem:[#allocation2] sm:$0xff]  ;;  %p165_p6 = pnand %p164_p5, %p158_p2 }
  0x2e   :  { %v59_v12 = vld [vmem:[#allocation4] sm:$0xff] }
  0xb5   :  { %v56_v8 = vpop.xlane.xlu0 %55  ;;  %v49_v9 = vpop.xlane.xlu1 %48 }
  0xb6   :  { %v57_v10 = vadd.f32 %v56_v8, %v53_v6  ;;  %v50_v11 = vadd.f32 %v49_v9, %v46_v7 }
  0xb8   :  { %58 = vst.msk [vmem:[#allocation3] sm:$0xff] %vm40_vm0, %v57_v10  ;;  %52 = vst.msk [vmem:[#allocation2] sm:$0xff] %vm40_vm0, %v50_v11 }
  0xb9   :  { %v62_v13 = vpop.xlane.xlu0 %61 }
  0xba   :  { %v63_v14 = vadd.f32 %v62_v13, %v59_v12 }
  0xbc   :  { %64 = vst.msk [vmem:[#allocation4] sm:$0xff] %vm40_vm0, %v63_v14 }
  0xbf   :  { %v69_v15 = vld [vmem:[#allocation3] sm:$0xff]  ;;  %v68_v20 = vld [vmem:[#allocation2] sm:$0xff] }
  0xc0   :  { %v70_v17 = vadd.f32 1e-12, %v69_v15 }
  0xc3   :  { %v71_v16 = vld [vmem:[#allocation4] sm:$0xff] }
  0xc4   :  { %v72_v18 = vadd.f32 1e-12, %v71_v16 }
  0xc6   :  { %v73_v19 = vmul.f32 %v72_v18, %v70_v17 }
  0xc8   :  { %111 = vrsqrt.f32 %v73_v19 }
  0xd2   :  { %v112_v21 = vpop.eup %111 }
  0xd3   :  { %v75_v22 = vmul.f32 %v112_v21, %v68_v20 }
  0xd5   :  { %v76_v23 = vsub.f32 1.0, %v75_v22 }
  0xd7   :  { %v77_v24 = vsel %vm40_vm0, %v76_v23, 0.0 }
  0xd8   :  { %78 = vadd.xlane.f32.xlu1 %v77_v24 }
 0x165   :  { %v79_v25 = vpop.xlane.xlu1 %78 }
 0x166   :  { %v80_v26 = vrot.slane %v79_v25, 4 }
 0x168   :  { %v81_v27 = vadd.f32 %v80_v26, %v79_v25 }
 0x16a   :  { %v82_v28 = vrot.slane %v81_v27, 2 }
 0x16c   :  { %v83_v29 = vadd.f32 %v82_v28, %v81_v27 }
 0x16e   :  { %v84_v30 = vrot.slane %v83_v29, 1 }
 0x170   :  { %v85_v31 = vadd.f32 %v84_v30, %v83_v29 }
 0x172   :  { %105 = vpush %v85_v31 }
 0x1a3   :  { %s106_s5 = spop %105 }
 0x1a4   :  { %v87_v32 = vstv %s106_s5 }
 0x1a5   :  { %88 = vst [vmem:[#allocation10] sm:$0xff] %v87_v32 }
 0x1a6   :  { %168 = shalt.err (!%p165_p6)
}
 0x1a7   :  { %s169_s9 = scalar_lea.hbm %s249_s2, 128 }
 0x1a8   :  { %p170_p7 = scmp.ne.s32.totalorder %s249_s2, %s169_s9  ;;  %p173_p8 = scmp.lt.u32.totalorder %s169_s9, %s249_s2 }
 0x1aa   :  { %p175_p9 = pnand %p173_p8, %p170_p7 }
 0x1ac   :  { %178 = shalt.err (!%p175_p9)
}
 0x1ad   :  { %98 = dma.vmem_to_hbm [thread:$0]  %s96_s4, 128, %s249_s2, [#allocation7]  }
 0x1ae   :  { %183 = dma.done.wait [#allocation7], 128  }
 0x1af   :  { %184 = vsyncadd [#allocation7], 4294967168 }
 0x1b0   :  { %102 = vsyncpa [#allocation6], 1 }
 0x1b1   :  { %103 = vsyncpa [#allocation9], 1 }
 0x1b2   :  { %104 = vsyncpa [#allocation7], 1 }

</bundles_post_ra>
